<compile_context>
chip_gen: v5e
topology: v5e:2x2
jax: 0.10.0
libtpu: 0.0.40
codegen_flags: <defaults>
</compile_context>

<pallas_src>
import jax
import jax.numpy as jnp
from jax.experimental import pallas as pl
from jax.experimental.pallas import tpu as pltpu


def _nnmodel_head_kernel(x_ref, d_ref, w1x_ref, w1d_ref, b1_ref, w2_ref, out_ref):
    """Fused head: sigmoid(relu(x@W1x + diff@W1d + b1) @ w2^T), row-layout store."""
    # In-kernel f32 -> bf16 cast of activations (VPU has slack; avoids a
    # separate HBM cast pass in the wrapper).
    xb = x_ref[...].astype(jnp.bfloat16)                        # (tb, F)
    db = d_ref[...].astype(jnp.bfloat16)                        # (tb, D)

    # First layer: split contraction, bf16 inputs -> f32 accumulation on MXU.
    h = jnp.dot(xb, w1x_ref[...], preferred_element_type=jnp.float32)
    h = h + jnp.dot(db, w1d_ref[...], preferred_element_type=jnp.float32)
    h = jnp.maximum(h + b1_ref[...], 0.0)                       # bias + ReLU (VPU)

    # Second layer (hidden -> 1), emitted directly as a (1, tb) row so the
    # output store is lane-packed (no per-row broadcast slab, no transpose of
    # a degenerate (tb, 1) column).
    hb = h.astype(jnp.bfloat16)                                 # (tb, HID)
    o = jnp.einsum("oh,bh->ob", w2_ref[...], hb,
                   preferred_element_type=jnp.float32)          # (1, tb) f32

    out_ref[...] = jax.nn.sigmoid(o)                            # EUP


def nnmodel_forward(x, diff, params, *, batch_tile=512):
    """Pallas implementation of the concrete NNModel.forward(x, diff) -> (B, 1)."""
    w1x, w1d, b1, w2 = params
    B = x.shape[0]
    F, HID = w1x.shape
    D = w1d.shape[0]

    # Glue (plain JAX): free row-major flatten of NCHW; NO bf16 cast pass for x
    # (done in-kernel).  Weights are cast once to bf16 (tiny, reused per tile).
    x_flat = jnp.reshape(x, (B, F)).astype(jnp.float32)         # (B, F) f32
    diff_f = diff.astype(jnp.float32)                           # (B, D) f32
    w1x_b = w1x.astype(jnp.bfloat16)
    w1d_b = w1d.astype(jnp.bfloat16)
    b1_f = jnp.reshape(b1, (1, HID)).astype(jnp.float32)
    w2_b = jnp.reshape(w2, (1, HID)).astype(jnp.bfloat16)

    args = (x_flat, diff_f, w1x_b, w1d_b, b1_f, w2_b)
    out_shape = jax.ShapeDtypeStruct((1, B), jnp.float32)       # lane-packed output

    if B >= 256:
        # Gridded, pipelined, batch-parallel path.  Choose a 128-aligned tile
        # that yields >= 2 grid steps (so v7x megacore can split the batch),
        # capped at batch_tile to stay well inside scoped VMEM on v5e.
        bt = max(128, (batch_tile // 128) * 128)
        tb = max(128, min(bt, ((B // 2) // 128) * 128))
        grid = (pl.cdiv(B, tb),)                                # partial last tile OK
        out = pl.pallas_call(
            _nnmodel_head_kernel,
            out_shape=out_shape,
            grid=grid,
            in_specs=[
                pl.BlockSpec((tb, F), lambda i: (i, 0)),
                pl.BlockSpec((tb, D), lambda i: (i, 0)),
                pl.BlockSpec((F, HID), lambda i: (0, 0)),
                pl.BlockSpec((D, HID), lambda i: (0, 0)),
                pl.BlockSpec((1, HID), lambda i: (0, 0)),
                pl.BlockSpec((1, HID), lambda i: (0, 0)),
            ],
            out_specs=pl.BlockSpec((1, tb), lambda i: (0, i)),
            compiler_params=pltpu.CompilerParams(
                dimension_semantics=("parallel",)),
        )(*args)
    else:
        # Small batch: no grid, whole arrays resident in VMEM (<< scoped limit),
        # no redundant double-buffering.
        vmem = pl.BlockSpec(memory_space=pltpu.MemorySpace.VMEM)
        out = pl.pallas_call(
            _nnmodel_head_kernel,
            out_shape=out_shape,
            in_specs=[vmem] * len(args),
            out_specs=vmem,
        )(*args)

    # (1, B) row -> logical (B, 1) output (cheap metadata reshape).
    return jnp.reshape(out, (B, 1))


def init_params(c, h, w, d, hidden, key):
    """Deterministic synthetic parameters (no checkpoint load)."""
    f = c * h * w
    fan_in = f + d
    k1, k2, k3 = jax.random.split(key, 3)
    scale = 1.0 / jnp.sqrt(jnp.float32(fan_in))
    w1x = jax.random.normal(k1, (f, hidden), jnp.float32) * scale
    w1d = jax.random.normal(k2, (d, hidden), jnp.float32) * scale
    b1 = jnp.zeros((1, hidden), jnp.float32)
    w2 = jax.random.normal(k3, (1, hidden), jnp.float32) * (
        1.0 / jnp.sqrt(jnp.float32(hidden)))
    return (w1x, w1d, b1, w2)


def reference_forward(x, diff, params):
    """Pure-JAX reference with the same bf16 rounding / f32 accumulation."""
    w1x, w1d, b1, w2 = params
    B = x.shape[0]
    f32 = jnp.float32
    xb = x.reshape(B, -1).astype(jnp.bfloat16).astype(f32)
    db = diff.astype(jnp.bfloat16).astype(f32)
    w1xb = w1x.astype(jnp.bfloat16).astype(f32)
    w1db = w1d.astype(jnp.bfloat16).astype(f32)
    h = jnp.maximum(xb @ w1xb + db @ w1db + b1.reshape(1, -1), 0.0)
    hb = h.astype(jnp.bfloat16).astype(f32)
    w2b = w2.reshape(1, -1).astype(jnp.bfloat16).astype(f32)
    o = jnp.sum(hb * w2b, axis=-1, keepdims=True)
    return jax.nn.sigmoid(o)


if __name__ == "__main__":
    # MXU-friendly shapes consistent with the (x, diff) interface:
    # F = C*H*W = 1024 (lane-aligned), HID = 128 (lane-aligned).
    C, H, W, D, HID = 4, 16, 16, 8, 128

    key = jax.random.PRNGKey(0)
    kp, kx1, kd1, kx2, kd2 = jax.random.split(key, 5)
    params = init_params(C, H, W, D, HID, kp)

    # 1) Small batch: ungridded whole-array-in-VMEM path.
    B1 = 8
    x1 = jax.random.normal(kx1, (B1, C, H, W), jnp.float32)
    d1 = jax.nn.one_hot(jax.random.randint(kd1, (B1,), 0, D), D,
                        dtype=jnp.float32)
    out1 = jax.block_until_ready(nnmodel_forward(x1, d1, params))
    ref1 = reference_forward(x1, d1, params)
    assert out1.shape == (B1, 1)
    assert jnp.allclose(out1, ref1, atol=2e-3, rtol=2e-3)

    # 2) Larger batch: gridded, pipelined, batch-parallel path (>= 2 grid steps).
    B2 = 512
    x2 = jax.random.normal(kx2, (B2, C, H, W), jnp.float32)
    d2 = jax.nn.one_hot(jax.random.randint(kd2, (B2,), 0, D), D,
                        dtype=jnp.float32)
    out2 = jax.block_until_ready(nnmodel_forward(x2, d2, params))
    ref2 = reference_forward(x2, d2, params)
    assert out2.shape == (B2, 1)
    assert jnp.allclose(out2, ref2, atol=2e-3, rtol=2e-3)

    print("KERNEL_OK")
</pallas_src>

<mosaic_0001>
module attributes {stable_mosaic.version = 11 : i64} {
  func.func @_nnmodel_head_kernel(%arg0: memref<8x1024xf32, #tpu.memory_space<vmem>>, %arg1: memref<8x8xf32, #tpu.memory_space<vmem>>, %arg2: memref<1024x128xbf16, #tpu.memory_space<vmem>>, %arg3: memref<8x128xbf16, #tpu.memory_space<vmem>>, %arg4: memref<1x128xf32, #tpu.memory_space<vmem>>, %arg5: memref<1x128xbf16, #tpu.memory_space<vmem>>, %arg6: memref<1x8xf32, #tpu.memory_space<vmem>>) attributes {dimension_semantics = [], scalar_prefetch = 0 : i64, scratch_operands = 0 : i64, tpu.core_type = #tpu.core_type<tc>} {
    %c0 = arith.constant 0 : index
    %c0_0 = arith.constant 0 : index
    %0 = vector.load %arg0[%c0, %c0_0] : memref<8x1024xf32, #tpu.memory_space<vmem>>, vector<8x1024xf32>
    %1 = arith.truncf %0 : vector<8x1024xf32> to vector<8x1024xbf16>
    %c0_1 = arith.constant 0 : index
    %c0_2 = arith.constant 0 : index
    %2 = vector.load %arg1[%c0_1, %c0_2] : memref<8x8xf32, #tpu.memory_space<vmem>>, vector<8x8xf32>
    %3 = arith.truncf %2 : vector<8x8xf32> to vector<8x8xbf16>
    %c0_3 = arith.constant 0 : index
    %c0_4 = arith.constant 0 : index
    %4 = vector.load %arg2[%c0_3, %c0_4] : memref<1024x128xbf16, #tpu.memory_space<vmem>>, vector<1024x128xbf16>
    %cst = arith.constant dense<0.000000e+00> : vector<8x128xf32>
    %5 = tpu.matmul %1, %4, %cst {dimension_numbers = #tpu.dot_dimension_numbers<[1], [0], [0], [1], [0, 0, 1, 1], [], []>} : vector<8x1024xbf16>, vector<1024x128xbf16>, vector<8x128xf32> -> vector<8x128xf32>
    %c0_5 = arith.constant 0 : index
    %c0_6 = arith.constant 0 : index
    %6 = vector.load %arg3[%c0_5, %c0_6] : memref<8x128xbf16, #tpu.memory_space<vmem>>, vector<8x128xbf16>
    %cst_7 = arith.constant dense<0.000000e+00> : vector<8x128xf32>
    %7 = tpu.matmul %3, %6, %cst_7 {dimension_numbers = #tpu.dot_dimension_numbers<[1], [0], [0], [1], [0, 0, 1, 1], [], []>} : vector<8x8xbf16>, vector<8x128xbf16>, vector<8x128xf32> -> vector<8x128xf32>
    %8 = arith.addf %5, %7 : vector<8x128xf32>
    %c0_8 = arith.constant 0 : index
    %c0_9 = arith.constant 0 : index
    %9 = vector.load %arg4[%c0_8, %c0_9] : memref<1x128xf32, #tpu.memory_space<vmem>>, vector<1x128xf32>
    %10 = vector.broadcast %9 : vector<1x128xf32> to vector<8x128xf32>
    %11 = arith.addf %8, %10 : vector<8x128xf32>
    %cst_10 = arith.constant 0.000000e+00 : f32
    %12 = vector.broadcast %cst_10 : f32 to vector<8x128xf32>
    %13 = arith.maximumf %11, %12 : vector<8x128xf32>
    %14 = arith.truncf %13 : vector<8x128xf32> to vector<8x128xbf16>
    %c0_11 = arith.constant 0 : index
    %c0_12 = arith.constant 0 : index
    %15 = vector.load %arg5[%c0_11, %c0_12] : memref<1x128xbf16, #tpu.memory_space<vmem>>, vector<1x128xbf16>
    "tpu.trace_start"() <{level = 10 : i32, message = "oh,bh->ob"}> : () -> ()
    %cst_13 = arith.constant dense<0.000000e+00> : vector<1x8xf32>
    %16 = tpu.matmul %15, %14, %cst_13 {dimension_numbers = #tpu.dot_dimension_numbers<[1], [1], [0], [0], [0, 0, 1, 0], [], []>} : vector<1x128xbf16>, vector<8x128xbf16>, vector<1x8xf32> -> vector<1x8xf32>
    "tpu.trace_stop"() : () -> ()
    %17 = arith.negf %16 : vector<1x8xf32>
    %18 = math.exp %17 : vector<1x8xf32>
    %cst_14 = arith.constant 1.000000e+00 : f32
    %19 = vector.broadcast %cst_14 : f32 to vector<1x8xf32>
    %20 = arith.addf %19, %18 : vector<1x8xf32>
    %21 = arith.divf %19, %20 : vector<1x8xf32>
    %c0_15 = arith.constant 0 : index
    %c0_16 = arith.constant 0 : index
    %22 = vector.load %arg6[%c0_15, %c0_16] : memref<1x8xf32, #tpu.memory_space<vmem>>, vector<1x8xf32>
    tpu.vector_store %arg6[%c0_15, %c0_16], %21 {strides = array<i32>} : memref<1x8xf32, #tpu.memory_space<vmem>>, vector<1x8xf32>,
    return
  }
}

</mosaic_0001>

<bundles_post_ra>
// kernel: tpu_custom_call.1
= control target key start
LH: loop header
LB: loop body
LE: loop exit
PB: predicated region body
PF: predicated region fallthrough
CT: control target
= control target key end

     0   :  { %11 = vsyncpa [#allocation3], 0  ;;  %s1324_s0 = inlined_call_operand.hbm [shape: f32[8,1024], index: 0, kind: input, shape index: {}]   ;;  %s1325_s1 = inlined_call_operand.hbm [shape: f32[8,8], index: 1, kind: input, shape index: {}]   ;;  %s1326_s2 = inlined_call_operand.hbm [shape: bf16[1024,128], index: 2, kind: input, shape index: {}]   ;;  %s1327_s3 = inlined_call_operand.hbm [shape: bf16[8,128], index: 3, kind: input, shape index: {}]   ;;  %s1328_s4 = inlined_call_operand.vmem [shape: f32[1,128], index: 4, kind: input, shape index: {}]   ;;  %s1329_s5 = inlined_call_operand.vmem [shape: bf16[1,128], index: 5, kind: input, shape index: {}]   ;;  %s1330_s6 = inlined_call_operand.hbm [shape: f32[1,8], index: 6, kind: output, shape index: {}]  }
   0x1   :  { %12 = vsyncpa [#allocation6], 0 }
   0x2   :  { %13 = vsyncpa [#allocation9], 0  ;;  %s31_s23 = sshll.u32 %s1325_s1, 4  ;;  %s32_s23 = int_to_ptr.hbm [resolvable:$true] %s31_s23 }
   0x3   :  { %14 = vsyncpa [#allocation4], 0  ;;  %s1261_s24 = smov [#allocation5]   ;;  %s20_s28 = sshll.u32 %s1324_s0, 4  ;;  %s21_s28 = int_to_ptr.hbm [resolvable:$true] %s20_s28 }
   0x4   :  { %s33_s25 = sshll.u32 %s1261_s24, 4  ;;  %s1262_s29 = smov [#allocation2]   ;;  %s34_s25 = int_to_ptr.vmem [resolvable:$true] %s33_s25 }
   0x5   :  { %36 = dma.hbm_to_vmem [thread:$0]  %s32_s23, 128, %s34_s25, [#allocation6]  }
   0x6   :  { %s22_s30 = sshll.u32 %s1262_s29, 4  ;;  %s41_s9 = sshll.u32 %s1326_s2, 4  ;;  %s23_s30 = int_to_ptr.vmem [resolvable:$true] %s22_s30  ;;  %s42_s9 = int_to_ptr.hbm [resolvable:$true] %s41_s9 }
   0x7   :  { %25 = dma.hbm_to_vmem [thread:$0]  %s21_s28, 1024, %s23_s30, [#allocation3]  }
   0x8   :  { %s1263_s1 = smov [#allocation7]   ;;  %s55_s13 = sshll.u32 %s1327_s3, 4  ;;  %s56_s13 = int_to_ptr.hbm [resolvable:$true] %s55_s13 }
   0x9   :  { %s43_s10 = sshll.u32 %s1263_s1, 4  ;;  %s1264_s14 = smov 64   ;;  %s44_s10 = int_to_ptr.vmem [resolvable:$true] %s43_s10 }
   0xa   :  { %s1265_s0 = smov 4   ;;  %s1266_s15 = smov [#allocation8]  }
   0xb   :  { %49 = dma.hbm_to_vmem [thread:$0]  %s42_s9, 8192, %s44_s10, [#allocation6], %s1264_s14, %s1264_s14, %s1265_s0  }
   0xc   :  { %s57_s16 = sshll.u32 %s1266_s15, 4  ;;  %s58_s16 = int_to_ptr.vmem [resolvable:$true] %s57_s16 }
   0xd   :  { %60 = dma.hbm_to_vmem [thread:$0]  %s56_s13, 64, %s58_s16, [#allocation9]  }
   0xe   :  { %1253 = dma.done.wait [#allocation3], 1024  }
   0xf   :  { %1254 = vsyncadd [#allocation3], 4294966272 }
  0x10   :  { %1255 = dma.done.wait [#allocation6], 8320  }
  0x11   :  { %1256 = vsyncadd [#allocation6], 4294958976 }
  0x12   :  { %1257 = dma.done.wait [#allocation9], 64  }
  0x13   :  { %1258 = vsyncadd [#allocation9], 4294967232  ;;  %vm233_vm0 = vcmask 1043456   ;;  %v1064_v0 = vld [vmem:[#allocation7 + $0x38] sm:$0xff]  ;;  %v228_v3 = vld [vmem:[#allocation8] sm:$0xf] }
  0x14   :  { %v1072_v1 = vld [vmem:[#allocation7 + $0x78] sm:$0xff]  ;;  %634 = vmatpush.bf16.msra.mxu1 %v1064_v0  ;;  %v235_v5 = vsel %vm233_vm0, %v228_v3, 0  ;;  %v1063_v6 = vld [vmem:[#allocation7 + $0x30] sm:$0xff]  ;;  %v1062_v10 = vld [vmem:[#allocation7 + $0x28] sm:$0xff]  ;;  %vm229_vm1 = vcmask 64512   ;;  %vm778_vm5 = vcmask 57344  }
  0x15   :  { %v1080_v2 = vld [vmem:[#allocation7 + $0xb8] sm:$0xff]  ;;  %647 = vmatpush.bf16.msra.mxu2 %v1072_v1  ;;  %v1071_v7 = vld [vmem:[#allocation7 + $0x70] sm:$0xff]  ;;  %244 = vmatpush.bf16.msra.mxu0 %v235_v5  ;;  %v1070_v11 = vld [vmem:[#allocation7 + $0x68] sm:$0xff] }
  0x16   :  { %v1088_v4 = vld [vmem:[#allocation7 + $0xf8] sm:$0xff]  ;;  %660 = vmatpush.bf16.msra.mxu3 %v1080_v2  ;;  %v1079_v8 = vld [vmem:[#allocation7 + $0xb0] sm:$0xff]  ;;  %v1078_v12 = vld [vmem:[#allocation7 + $0xa8] sm:$0xff] }
  0x17   :  { %v1087_v9 = vld [vmem:[#allocation7 + $0xf0] sm:$0xff]  ;;  %v1086_v13 = vld [vmem:[#allocation7 + $0xe8] sm:$0xff]  ;;  %v98_v14 = vld [vmem:[#allocation5] sm:$0xff] }
  0x18   :  { %635 = vmatpush.bf16.msra.mxu1 %v1063_v6  ;;  %v1061_v15 = vld [vmem:[#allocation7 + $0x20] sm:$0xff]  ;;  %v99_v17 = vpack.c.bf16 %v98_v14, %v98_v14  ;;  %v1060_v20 = vld [vmem:[#allocation7 + $0x18] sm:$0xff]  ;;  %v1059_v24 = vld [vmem:[#allocation7 + $0x10] sm:$0xff] }
  0x19   :  { %673 = vmatpush.bf16.msrb.mxu0 %v1088_v4  ;;  %648 = vmatpush.bf16.msra.mxu2 %v1071_v7  ;;  %v1069_v16 = vld [vmem:[#allocation7 + $0x60] sm:$0xff]  ;;  %v1068_v21 = vld [vmem:[#allocation7 + $0x58] sm:$0xff]  ;;  %v1067_v25 = vld [vmem:[#allocation7 + $0x50] sm:$0xff] }
  0x1a   :  { %661 = vmatpush.bf16.msra.mxu3 %v1079_v8  ;;  %v1077_v18 = vld [vmem:[#allocation7 + $0xa0] sm:$0xff]  ;;  %799 = vmatmul.msk.bf16.vlgmr.msra.gmra.mxu0 %vm229_vm1, %v99_v17  ;;  %v1076_v22 = vld [vmem:[#allocation7 + $0x98] sm:$0xff]  ;;  %v1075_v26 = vld [vmem:[#allocation7 + $0x90] sm:$0xff] }
  0x1b   :  { %v1085_v19 = vld [vmem:[#allocation7 + $0xe0] sm:$0xff]  ;;  %v1084_v23 = vld [vmem:[#allocation7 + $0xd8] sm:$0xff]  ;;  %v1083_v27 = vld [vmem:[#allocation7 + $0xd0] sm:$0xff] }
  0x1c   :  { %636 = vmatpush.bf16.msra.mxu1 %v1062_v10  ;;  %v1058_v28 = vld [vmem:[#allocation7 + $0x8] sm:$0xff]  ;;  %v1057_v32 = vld [vmem:[#allocation7] sm:$0xff]  ;;  %v1096_v36 = vld [vmem:[#allocation7 + $0x138] sm:$0xff] }
  0x1d   :  { %674 = vmatpush.bf16.msrb.mxu0 %v1087_v9  ;;  %649 = vmatpush.bf16.msra.mxu2 %v1070_v11  ;;  %v1066_v29 = vld [vmem:[#allocation7 + $0x48] sm:$0xff]  ;;  %v1065_v33 = vld [vmem:[#allocation7 + $0x40] sm:$0xff]  ;;  %v1104_v38 = vld [vmem:[#allocation7 + $0x178] sm:$0xff] }
  0x1e   :  { %662 = vmatpush.bf16.msra.mxu3 %v1078_v12  ;;  %v1074_v30 = vld [vmem:[#allocation7 + $0x88] sm:$0xff]  ;;  %v83_v34 = vld [vmem:[#allocation2 + $0x8] sm:$0xff]  ;;  %v1112_v39 = vld [vmem:[#allocation7 + $0x1b8] sm:$0xff] }
  0x1f   :  { %v1082_v31 = vld [vmem:[#allocation7 + $0xc8] sm:$0xff]  ;;  %v1073_v35 = vld [vmem:[#allocation7 + $0x80] sm:$0xff]  ;;  %v91_v41 = vpack.c.bf16 %v83_v34, %v83_v34  ;;  %v1120_v42 = vld [vmem:[#allocation7 + $0x1f8] sm:$0xff] }
  0x20   :  { %637 = vmatpush.bf16.msra.mxu1 %v1061_v15  ;;  %v84_v37 = vld [vmem:[#allocation2 + $0x10] sm:$0xff]  ;;  %v1081_v40 = vld [vmem:[#allocation7 + $0xc0] sm:$0xff]  ;;  %v82_v44 = vld [vmem:[#allocation2] sm:$0xff] }
  0x21   :  { %675 = vmatpush.bf16.msrb.mxu0 %v1086_v13  ;;  %650 = vmatpush.bf16.msra.mxu2 %v1069_v16  ;;  %v92_v43 = vpack.c.bf16 %v84_v37, %v84_v37  ;;  %v85_v45 = vld [vmem:[#allocation2 + $0x18] sm:$0xff]  ;;  %v90_v49 = vpack.c.bf16 %v82_v44, %v82_v44  ;;  %v1094_v52 = vld [vmem:[#allocation7 + $0x128] sm:$0xff]  ;;  %v1093_v56 = vld [vmem:[#allocation7 + $0x120] sm:$0xff] }
  0x22   :  { %663 = vmatpush.bf16.msra.mxu3 %v1077_v18  ;;  %v1095_v46 = vld [vmem:[#allocation7 + $0x130] sm:$0xff]  ;;  %v93_v50 = vpack.c.bf16 %v85_v45, %v85_v45  ;;  %v1102_v53 = vld [vmem:[#allocation7 + $0x168] sm:$0xff]  ;;  %v1101_v57 = vld [vmem:[#allocation7 + $0x160] sm:$0xff] }
  0x23   :  { %v1103_v47 = vld [vmem:[#allocation7 + $0x170] sm:$0xff]  ;;  %v1110_v54 = vld [vmem:[#allocation7 + $0x1a8] sm:$0xff]  ;;  %v1109_v58 = vld [vmem:[#allocation7 + $0x1a0] sm:$0xff] }
  0x24   :  { %638 = vmatpush.bf16.msra.mxu1 %v1060_v20  ;;  %v1111_v48 = vld [vmem:[#allocation7 + $0x1b0] sm:$0xff]  ;;  %v1118_v55 = vld [vmem:[#allocation7 + $0x1e8] sm:$0xff]  ;;  %v1117_v59 = vld [vmem:[#allocation7 + $0x1e0] sm:$0xff] }
  0x25   :  { %676 = vmatpush.bf16.msrb.mxu0 %v1085_v19  ;;  %651 = vmatpush.bf16.msra.mxu2 %v1068_v21  ;;  %v1119_v51 = vld [vmem:[#allocation7 + $0x1f0] sm:$0xff]  ;;  %v1092_v60 = vld [vmem:[#allocation7 + $0x118] sm:$0xff]  ;;  %v1090_v4 = vld [vmem:[#allocation7 + $0x108] sm:$0xff] }
  0x26   :  { %664 = vmatpush.bf16.msra.mxu3 %v1076_v22  ;;  %v1100_v61 = vld [vmem:[#allocation7 + $0x158] sm:$0xff]  ;;  %v1091_v0 = vld [vmem:[#allocation7 + $0x110] sm:$0xff]  ;;  %v1098_v5 = vld [vmem:[#allocation7 + $0x148] sm:$0xff] }
  0x27   :  { %v1108_v62 = vld [vmem:[#allocation7 + $0x198] sm:$0xff]  ;;  %v1099_v1 = vld [vmem:[#allocation7 + $0x150] sm:$0xff]  ;;  %v1106_v6 = vld [vmem:[#allocation7 + $0x188] sm:$0xff] }
  0x28   :  { %639 = vmatpush.bf16.msra.mxu1 %v1059_v24  ;;  %v1116_v63 = vld [vmem:[#allocation7 + $0x1d8] sm:$0xff]  ;;  %v1107_v2 = vld [vmem:[#allocation7 + $0x190] sm:$0xff]  ;;  %v1114_v7 = vld [vmem:[#allocation7 + $0x1c8] sm:$0xff] }
  0x29   :  { %677 = vmatpush.bf16.msrb.mxu0 %v1084_v23  ;;  %652 = vmatpush.bf16.msra.mxu2 %v1067_v25  ;;  %v1115_v3 = vld [vmem:[#allocation7 + $0x1d0] sm:$0xff]  ;;  %v1089_v8 = vld [vmem:[#allocation7 + $0x100] sm:$0xff]  ;;  %v86_v10 = vld [vmem:[#allocation2 + $0x20] sm:$0xff] }
  0x2a   :  { %665 = vmatpush.bf16.msra.mxu3 %v1075_v26  ;;  %v1097_v9 = vld [vmem:[#allocation7 + $0x140] sm:$0xff]  ;;  %v88_v13 = vld [vmem:[#allocation2 + $0x30] sm:$0xff]  ;;  %v94_v15 = vpack.c.bf16 %v86_v10, %v86_v10  ;;  %v89_v16 = vld [vmem:[#allocation2 + $0x38] sm:$0xff] }
  0x2b   :  { %v1105_v11 = vld [vmem:[#allocation7 + $0x180] sm:$0xff]  ;;  %v96_v18 = vpack.c.bf16 %v88_v13, %v88_v13  ;;  %v97_v19 = vpack.c.bf16 %v89_v16, %v89_v16 }
  0x2c   :  { %640 = vmatpush.bf16.msra.mxu1 %v1058_v28  ;;  %v87_v12 = vld [vmem:[#allocation2 + $0x28] sm:$0xff] }
  0x2d   :  { %678 = vmatpush.bf16.msrb.mxu0 %v1083_v27  ;;  %653 = vmatpush.bf16.msra.mxu2 %v1066_v29  ;;  %v1113_v14 = vld [vmem:[#allocation7 + $0x1c0] sm:$0xff]  ;;  %v95_v17 = vpack.c.bf16 %v87_v12, %v87_v12 }
  0x2e   :  { %666 = vmatpush.bf16.msra.mxu3 %v1074_v30 }
  0x30   :  { %641 = vmatpush.bf16.msra.mxu1 %v1057_v32 }
  0x31   :  { %679 = vmatpush.bf16.msrb.mxu0 %v1082_v31  ;;  %654 = vmatpush.bf16.msra.mxu2 %v1065_v33 }
  0x32   :  { %667 = vmatpush.bf16.msra.mxu3 %v1073_v35 }
  0x33   :  { %642 = vmatmul.bf16.vlgmr.msra.gmra.mxu1 %v90_v49 }
  0x34   :  { %686 = vmatpush.bf16.msrb.mxu1 %v1096_v36  ;;  %655 = vmatmul.bf16.vlgmr.msra.gmra.mxu2 %v91_v41 }
  0x35   :  { %699 = vmatpush.bf16.msrb.mxu2 %v1104_v38  ;;  %680 = vmatpush.bf16.msrb.mxu0 %v1081_v40 }
  0x36   :  { %712 = vmatpush.bf16.msrb.mxu3 %v1112_v39 }
  0x37   :  { %668 = vmatmul.bf16.vlgmr.msra.gmra.mxu3 %v92_v43 }
  0x38   :  { %687 = vmatpush.bf16.msrb.mxu1 %v1095_v46  ;;  %681 = vmatmul.bf16.vlgmr.msrb.gmra.mxu0 %v93_v50  ;;  %v745_v50 = vld [vmem:[%s1329_s5] sm:$0x1]  ;;  %s787_s5 = sshll.u32 %s1330_s6, 4  ;;  %s788_s5 = int_to_ptr.hbm [resolvable:$true] %s787_s5 }
  0x39   :  { %725 = vmatpush.bf16.msra.mxu0 %v1120_v42  ;;  %700 = vmatpush.bf16.msrb.mxu2 %v1103_v47  ;;  %v1128_v42 = vld [vmem:[%s1328_s4] ss:$0 sm:$0xff]  ;;  %s1267_s4 = smov [#allocation10]  }
  0x3a   :  { %713 = vmatpush.bf16.msrb.mxu3 %v1111_v48  ;;  %s785_s19 = sshll.u32 %s1267_s4, 4  ;;  %s786_s19 = int_to_ptr.vmem [resolvable:$true] %s785_s19 }
  0x3c   :  { %688 = vmatpush.bf16.msrb.mxu1 %v1094_v52 }
  0x3d   :  { %726 = vmatpush.bf16.msra.mxu0 %v1119_v51  ;;  %701 = vmatpush.bf16.msrb.mxu2 %v1102_v53 }
  0x3e   :  { %714 = vmatpush.bf16.msrb.mxu3 %v1110_v54 }
  0x40   :  { %689 = vmatpush.bf16.msrb.mxu1 %v1093_v56 }
  0x41   :  { %727 = vmatpush.bf16.msra.mxu0 %v1118_v55  ;;  %702 = vmatpush.bf16.msrb.mxu2 %v1101_v57 }
  0x42   :  { %715 = vmatpush.bf16.msrb.mxu3 %v1109_v58 }
  0x44   :  { %690 = vmatpush.bf16.msrb.mxu1 %v1092_v60 }
  0x45   :  { %728 = vmatpush.bf16.msra.mxu0 %v1117_v59  ;;  %703 = vmatpush.bf16.msrb.mxu2 %v1100_v61 }
  0x46   :  { %716 = vmatpush.bf16.msrb.mxu3 %v1108_v62 }
  0x48   :  { %691 = vmatpush.bf16.msrb.mxu1 %v1091_v0 }
  0x49   :  { %729 = vmatpush.bf16.msra.mxu0 %v1116_v63  ;;  %704 = vmatpush.bf16.msrb.mxu2 %v1099_v1 }
  0x4a   :  { %717 = vmatpush.bf16.msrb.mxu3 %v1107_v2 }
  0x4c   :  { %692 = vmatpush.bf16.msrb.mxu1 %v1090_v4 }
  0x4d   :  { %730 = vmatpush.bf16.msra.mxu0 %v1115_v3  ;;  %705 = vmatpush.bf16.msrb.mxu2 %v1098_v5 }
  0x4e   :  { %718 = vmatpush.bf16.msrb.mxu3 %v1106_v6 }
  0x50   :  { %693 = vmatpush.bf16.msrb.mxu1 %v1089_v8 }
  0x51   :  { %731 = vmatpush.bf16.msra.mxu0 %v1114_v7  ;;  %706 = vmatpush.bf16.msrb.mxu2 %v1097_v9 }
  0x52   :  { %719 = vmatpush.bf16.msrb.mxu3 %v1105_v11 }
  0x53   :  { %694 = vmatmul.bf16.vlgmr.msrb.gmra.mxu1 %v94_v15 }
  0x54   :  { %707 = vmatmul.bf16.vlgmr.msrb.gmra.mxu2 %v95_v17 }
  0x55   :  { %732 = vmatpush.bf16.msra.mxu0 %v1113_v14  ;;  %720 = vmatmul.bf16.vlgmr.msrb.gmra.mxu3 %v96_v18 }
  0x58   :  { %733 = vmatmul.bf16.vlgmr.msra.gmra.mxu0 %v97_v19 }
  0x97   :  { %v246_v20 = vpop.f32.mrf.mxu0 }
  0x9f   :  { %v248_v21 = vpop.f32.mrf.mxu0 }
  0xb0   :  { %v643_v22 = vpop.f32.mrf.mxu1 }
  0xb1   :  { %v644_v30 = vadd.f32 %v643_v22, %v246_v20 }
  0xb5   :  { %v682_v23 = vpop.f32.mrf.mxu0 }
  0xb7   :  { %v656_v24 = vpop.f32.mrf.mxu2 }
  0xb8   :  { %v645_v26 = vpop.f32.mrf.mxu1  ;;  %v657_v31 = vadd.f32 %v656_v24, %v644_v30 }
  0xba   :  { %v669_v25 = vpop.f32.mrf.mxu3 }
  0xbb   :  { %v670_v32 = vadd.f32 %v669_v25, %v657_v31 }
  0xbd   :  { %v684_v27 = vpop.f32.mrf.mxu0  ;;  %v683_v35 = vadd.f32 %v682_v23, %v670_v32 }
  0xbf   :  { %v658_v28 = vpop.f32.mrf.mxu2 }
  0xc2   :  { %v671_v29 = vpop.f32.mrf.mxu3 }
  0xd0   :  { %v695_v33 = vpop.f32.mrf.mxu1 }
  0xd1   :  { %v696_v36 = vadd.f32 %v695_v33, %v683_v35 }
  0xd5   :  { %v734_v34 = vpop.f32.mrf.mxu0 }
  0xd7   :  { %v708_v37 = vpop.f32.mrf.mxu2 }
  0xd8   :  { %v721_v38 = vpop.f32.mrf.mxu3  ;;  %v709_v39 = vadd.f32 %v708_v37, %v696_v36  ;;  %v697_v40 = vpop.f32.mrf.mxu1 }
  0xda   :  { %v722_v41 = vadd.f32 %v721_v38, %v709_v39 }
  0xdc   :  { %v735_v44 = vadd.f32 %v734_v34, %v722_v41 }
  0xdd   :  { %v736_v43 = vpop.f32.mrf.mxu0 }
  0xde   :  { %v742_v45 = vadd.f32 %v1128_v42, %v735_v44 }
  0xdf   :  { %v710_v46 = vpop.f32.mrf.mxu2 }
  0xe0   :  { %v723_v47 = vpop.f32.mrf.mxu3  ;;  %v743_v48 = vmax.f32 %v742_v45, 0.0 }
  0xe2   :  { %v744_v49 = vpack.c.bf16 %v743_v48, %v743_v48 }
  0xe4   :  { %753 = vmatpush.bf16.xpose.msra.mxu1 %v744_v49 }
  0xeb   :  { %754 = vmatmul.bf16.vlgmr.msra.gmra.mxu1 %v745_v50 }
 0x168   :  { %v755_v51 = vpop.f32.mrf.mxu1 }
 0x169   :  { %v1056_v52 = vmul.f32 -1.442695, %v755_v51 }
 0x16b   :  { %1129 = vpow2.f32 %v1056_v52 }
 0x170   :  { %v757_v53 = vpop.f32.mrf.mxu1 }
 0x171   :  { %v1130_v54 = vpop.eup %1129 }
 0x172   :  { %v762_v55 = vadd.f32 1.0, %v1130_v54 }
 0x174   :  { %1131 = vrcp.f32 %v762_v55  ;;  %v774_v59 = vand.u32 2147483648, %v762_v55  ;;  %v772_v61 = vand.u32 2147483647, %v762_v55  ;;  %vm768_vm3 = vweird.f32 %v762_v55 }
 0x176   :  { %v775_v63 = vor.u32 1.1754944e-38, %v774_v59  ;;  %vm773_vm6 = vcmp.eq.f32.partialorder %v772_v61, 8.507059e+37 }
 0x17a   :  { %v1132_v56 = vpop.eup %1131 }
 0x17b   :  { %v764_v57 = vmul.f32 %v1132_v56, %v762_v55  ;;  %vm769_vm2 = vweird.f32 %v1132_v56 }
 0x17c   :  { %vm770_vm4 = vmor %vm768_vm3, %vm769_vm2 }
 0x17d   :  { %v765_v58 = vsub.f32 1.0, %v764_v57 }
 0x17f   :  { %v766_v60 = vmul.f32 %v1132_v56, %v765_v58 }
 0x181   :  { %v767_v62 = vadd.f32 %v1132_v56, %v766_v60 }
 0x183   :  { %v771_v0 = vsel %vm770_vm4, %v1132_v56, %v767_v62 }
 0x184   :  { %v776_v1 = vsel %vm773_vm6, %v775_v63, %v771_v0 }
 0x185   :  { %779 = vst.msk [vmem:[#allocation10] sm:$0x1] %vm778_vm5, %v776_v1 }
 0x186   :  { %790 = dma.vmem_to_hbm [thread:$0]  %s786_s19, 16, %s788_s5, [#allocation4]  }
 0x187   :  { %1259 = dma.done.wait [#allocation4], 16  }
 0x188   :  { %1260 = vsyncadd [#allocation4], 4294967280 }
 0x189   :  { %795 = vsyncpa [#allocation3], 1 }
 0x18a   :  { %796 = vsyncpa [#allocation6], 1 }
 0x18b   :  { %797 = vsyncpa [#allocation9], 1 }
 0x18c   :  { %798 = vsyncpa [#allocation4], 1 }

</bundles_post_ra>
